<compile_context>
chip_gen: v5e
topology: v5e:2x2
jax: 0.10.0
libtpu: 0.0.40
codegen_flags: <defaults>
</compile_context>

<pallas_src>
import jax
import jax.numpy as jnp
from jax.experimental import pallas as pl
from jax.experimental.pallas import tpu as pltpu


def _round_up(v, m):
    return (v + m - 1) // m * m


def _make_fan_kernel(h_pad):
    def fan_kernel(x_ref, wab_ref, bab_ref, wct_ref, wcb_ref, bc_ref, o_ref):
        # bf16 operands for the MXU, f32 accumulation everywhere.
        x = x_ref[...].astype(jnp.bfloat16)                  # (TM, D)

        # Fused branch GEMM: [Wa | Ws] -> (TM, 2*h_pad), single MXU call.
        h = jnp.dot(x, wab_ref[...], preferred_element_type=jnp.float32)
        h = h + bab_ref[...]                                 # f32 bias (incl. -1e30 pad lanes)
        logits = h[:, :h_pad]                                # attn branch (lane-padded)
        s = h[:, h_pad:]                                     # value branch (lane-padded)

        # Softmax over the last dim.  Padded lanes carry a -1e30 bias -> exp == 0,
        # so they contribute nothing to the denominator and their weights are 0.
        m = jnp.max(logits, axis=-1, keepdims=True)
        e = jnp.exp(logits - m)
        denom = jnp.sum(e, axis=-1, keepdims=True)
        attn_weights = e * pl.reciprocal(denom, approx=True)  # EUP slot, ~free

        q_s = jnp.maximum(s, 0.0)                            # relu (padded lanes -> 0)
        attn_applied = attn_weights * q_s

        # Output projection without a lane-dim concat:
        #   cat([q_s, attn_applied], 1) @ Wc == q_s @ Wc_top + attn_applied @ Wc_bot
        out = jnp.dot(q_s.astype(jnp.bfloat16), wct_ref[...],
                      preferred_element_type=jnp.float32)
        out = out + jnp.dot(attn_applied.astype(jnp.bfloat16), wcb_ref[...],
                            preferred_element_type=jnp.float32)
        out = out + bc_ref[...]
        o_ref[...] = out.astype(o_ref.dtype)

    return fan_kernel


def fan_forward(x, wa, ba, ws, bs, wc, bc, *, tile_m=2048):
    """x: (N, D); wa/ws: (D, 3D) (pre-transposed, in x out); ba/bs: (3D,) or (1, 3D);
    wc: (6D, C); bc: (C,) or (1, C).  Returns (N, C) in x.dtype."""
    N, D = x.shape
    D3 = wa.shape[1]
    C = wc.shape[1]
    assert wa.shape == (D, D3) and ws.shape == (D, D3)
    assert wc.shape == (2 * D3, C)

    f32 = jnp.float32
    bf16 = jnp.bfloat16
    h_pad = max(128, _round_up(D3, 128))   # lane-pad branch width (3D) to 128-multiple

    # --- parameter preparation (one-time XLA work; negligible) ---
    neg = jnp.asarray(-1e30, f32)
    wa_p = jnp.zeros((D, h_pad), f32).at[:, :D3].set(wa.astype(f32))
    ws_p = jnp.zeros((D, h_pad), f32).at[:, :D3].set(ws.astype(f32))
    ba_p = jnp.full((1, h_pad), neg, f32).at[:, :D3].set(jnp.reshape(ba, (1, -1)).astype(f32))
    bs_p = jnp.zeros((1, h_pad), f32).at[:, :D3].set(jnp.reshape(bs, (1, -1)).astype(f32))
    wab = jnp.concatenate([wa_p, ws_p], axis=1).astype(bf16)  # (D, 2*h_pad) bf16 (MXU)
    bab = jnp.concatenate([ba_p, bs_p], axis=1)               # (1, 2*h_pad) f32

    wc_top = jnp.zeros((h_pad, C), f32).at[:D3].set(wc[:D3].astype(f32)).astype(bf16)
    wc_bot = jnp.zeros((h_pad, C), f32).at[:D3].set(wc[D3:].astype(f32)).astype(bf16)
    bc_p = jnp.reshape(bc, (1, -1)).astype(f32)                # (1, C)

    # --- row tiling ---
    # Big tiles amortize the ~0.35us/step pipeline overhead; cap at ~ceil(N/2)
    # (rounded to the 8-row sublane quantum) so the grid always has >= 2 steps
    # and "parallel" can shard rows across both v7x TensorCores.  tile_m=2048
    # keeps the (TM, 256) f32 intermediates well inside v7x's 64 MiB VMEM.
    half_n = _round_up(max(1, -(-N // 2)), 8)
    tile_m = max(8, min(_round_up(tile_m, 8), half_n))
    grid_m = pl.cdiv(N, tile_m)           # ragged tail handled by Pallas boundary clipping

    flops = 2 * N * D * (2 * h_pad) + 2 * 2 * N * h_pad * C
    transcendentals = N * h_pad           # exp
    bytes_accessed = (x.size * x.dtype.itemsize + wab.size * 2 + bab.size * 4
                      + wc_top.size * 2 + wc_bot.size * 2 + bc_p.size * 4
                      + N * C * jnp.dtype(x.dtype).itemsize)

    out = pl.pallas_call(
        _make_fan_kernel(h_pad),
        out_shape=jax.ShapeDtypeStruct((N, C), x.dtype),
        grid_spec=pltpu.PrefetchScalarGridSpec(
            num_scalar_prefetch=0,
            grid=(grid_m,),
            in_specs=[
                pl.BlockSpec((tile_m, D), lambda i: (i, 0)),        # x tile (streamed)
                pl.BlockSpec((D, 2 * h_pad), lambda i: (0, 0)),     # fused Wa|Ws (resident, bf16)
                pl.BlockSpec((1, 2 * h_pad), lambda i: (0, 0)),     # fused ba|bs (f32)
                pl.BlockSpec((h_pad, C), lambda i: (0, 0)),         # Wc top half (bf16)
                pl.BlockSpec((h_pad, C), lambda i: (0, 0)),         # Wc bottom half (bf16)
                pl.BlockSpec((1, C), lambda i: (0, 0)),             # bc
            ],
            out_specs=pl.BlockSpec((tile_m, C), lambda i: (i, 0)),  # true-width output
        ),
        compiler_params=pltpu.CompilerParams(
            dimension_semantics=("parallel",),
        ),
        cost_estimate=pl.CostEstimate(
            flops=flops,
            transcendentals=transcendentals,
            bytes_accessed=bytes_accessed,
        ),
    )(x, wab, bab, wc_top, wc_bot, bc_p)

    return out


def fan_reference(x, wa, ba, ws, bs, wc, bc):
    logits = x @ wa + ba
    attn_weights = jax.nn.softmax(logits, axis=-1)
    q_s = jax.nn.relu(x @ ws + bs)
    attn_applied = attn_weights * q_s
    combine = jnp.concatenate([q_s, attn_applied], axis=1)
    return combine @ wc + bc


if __name__ == "__main__":
    # Small shapes consistent with the module.
    D = 32                       # Data_Vector_Length
    C = 32                       # args.centord_Vector_Length (chosen here)
    D3, D6 = 3 * D, 6 * D

    key = jax.random.PRNGKey(0)
    kx, kwa, kba, kws, kbs, kwc, kbc = jax.random.split(key, 7)

    # Deterministic parameter init (weights stored as (in, out), biases as (out,)).
    scale_a = 1.0 / jnp.sqrt(D)
    scale_c = 1.0 / jnp.sqrt(D6)
    wa = jax.random.uniform(kwa, (D, D3), minval=-scale_a, maxval=scale_a, dtype=jnp.float32)
    ba = jax.random.uniform(kba, (D3,), minval=-scale_a, maxval=scale_a, dtype=jnp.float32)
    ws = jax.random.uniform(kws, (D, D3), minval=-scale_a, maxval=scale_a, dtype=jnp.float32)
    bs = jax.random.uniform(kbs, (D3,), minval=-scale_a, maxval=scale_a, dtype=jnp.float32)
    wc = jax.random.uniform(kwc, (D6, C), minval=-scale_c, maxval=scale_c, dtype=jnp.float32)
    bc = jax.random.uniform(kbc, (C,), minval=-scale_c, maxval=scale_c, dtype=jnp.float32)

    # Tolerances account for bf16 MXU operands (f32 accumulation).
    TOL = dict(atol=1e-2, rtol=1e-2)

    # Test 1: N=48 -> tile cap = 24 rows, 2-step grid (exercises the >=2-step / megacore path).
    N1 = 48
    x1 = jax.random.normal(kx, (N1, D), dtype=jnp.float32)
    ref1 = fan_reference(x1, wa, ba, ws, bs, wc, bc)
    out1 = jax.block_until_ready(fan_forward(x1, wa, ba, ws, bs, wc, bc))
    assert out1.shape == (N1, C)
    assert jnp.allclose(out1, ref1, **TOL), "Pallas output mismatch (N=48)"

    # Test 2: N=50 -> tile=32, grid=2 with a ragged tail block (exercises boundary clipping,
    # no wrapper-side pad of x and no post-kernel slice).
    N2 = 50
    x2 = jax.random.normal(jax.random.PRNGKey(1), (N2, D), dtype=jnp.float32)
    ref2 = fan_reference(x2, wa, ba, ws, bs, wc, bc)
    out2 = jax.block_until_ready(fan_forward(x2, wa, ba, ws, bs, wc, bc))
    assert out2.shape == (N2, C)
    assert jnp.allclose(out2, ref2, **TOL), "Pallas output mismatch (ragged N=50)"

    print("KERNEL_OK")
</pallas_src>

<mosaic_0001>
module attributes {stable_mosaic.version = 11 : i64} {
  func.func @fan_kernel(%arg0: i32, %arg1: memref<24x32xf32, #tpu.memory_space<vmem>>, %arg2: memref<32x256xbf16, #tpu.memory_space<vmem>>, %arg3: memref<1x256xf32, #tpu.memory_space<vmem>>, %arg4: memref<128x32xbf16, #tpu.memory_space<vmem>>, %arg5: memref<128x32xbf16, #tpu.memory_space<vmem>>, %arg6: memref<1x32xf32, #tpu.memory_space<vmem>>, %arg7: memref<24x32xf32, #tpu.memory_space<vmem>>) attributes {dimension_semantics = [#tpu.dimension_semantics<parallel>], iteration_bounds = array<i64: 2>, scalar_prefetch = 0 : i64, scratch_operands = 0 : i64, tpu.core_type = #tpu.core_type<tc>, window_params = [{transform_indices = @transform_0, window_bounds = array<i64: 24, 32>}, {pipeline_mode = #tpu.pipeline_mode<synchronous>, transform_indices = @transform_1, window_bounds = array<i64: 32, 256>}, {pipeline_mode = #tpu.pipeline_mode<synchronous>, transform_indices = @transform_2, window_bounds = array<i64: 1, 256>}, {pipeline_mode = #tpu.pipeline_mode<synchronous>, transform_indices = @transform_3, window_bounds = array<i64: 128, 32>}, {pipeline_mode = #tpu.pipeline_mode<synchronous>, transform_indices = @transform_4, window_bounds = array<i64: 128, 32>}, {pipeline_mode = #tpu.pipeline_mode<synchronous>, transform_indices = @transform_5, window_bounds = array<i64: 1, 32>}, {transform_indices = @transform_6, window_bounds = array<i64: 24, 32>}]} {
    %c0 = arith.constant 0 : index
    %c0_0 = arith.constant 0 : index
    %0 = vector.load %arg1[%c0, %c0_0] : memref<24x32xf32, #tpu.memory_space<vmem>>, vector<24x32xf32>
    %1 = arith.truncf %0 : vector<24x32xf32> to vector<24x32xbf16>
    %c0_1 = arith.constant 0 : index
    %c0_2 = arith.constant 0 : index
    %2 = vector.load %arg2[%c0_1, %c0_2] : memref<32x256xbf16, #tpu.memory_space<vmem>>, vector<32x256xbf16>
    %cst = arith.constant dense<0.000000e+00> : vector<24x256xf32>
    %3 = tpu.matmul %1, %2, %cst {dimension_numbers = #tpu.dot_dimension_numbers<[1], [0], [0], [1], [0, 0, 1, 1], [], []>} : vector<24x32xbf16>, vector<32x256xbf16>, vector<24x256xf32> -> vector<24x256xf32>
    %c0_3 = arith.constant 0 : index
    %c0_4 = arith.constant 0 : index
    %4 = vector.load %arg3[%c0_3, %c0_4] : memref<1x256xf32, #tpu.memory_space<vmem>>, vector<1x256xf32>
    %5 = vector.broadcast %4 : vector<1x256xf32> to vector<24x256xf32>
    %6 = arith.addf %3, %5 : vector<24x256xf32>
    %7 = vector.extract_strided_slice %6 {offsets = [0, 0], sizes = [24, 128], strides = [1, 1]} : vector<24x256xf32> to vector<24x128xf32>
    %8 = vector.extract_strided_slice %6 {offsets = [0, 128], sizes = [24, 128], strides = [1, 1]} : vector<24x256xf32> to vector<24x128xf32>
    %cst_5 = arith.constant dense<0xFF800000> : vector<24xf32>
    %9 = vector.multi_reduction <maximumf>, %7, %cst_5 [1] : vector<24x128xf32> to vector<24xf32>
    %10 = vector.shape_cast %9 : vector<24xf32> to vector<24x1xf32>
    %11 = vector.broadcast %10 : vector<24x1xf32> to vector<24x128xf32>
    %12 = arith.subf %7, %11 : vector<24x128xf32>
    %13 = math.exp %12 : vector<24x128xf32>
    %cst_6 = arith.constant dense<0.000000e+00> : vector<24xf32>
    %14 = vector.multi_reduction <add>, %13, %cst_6 [1] : vector<24x128xf32> to vector<24xf32>
    %15 = vector.shape_cast %14 : vector<24xf32> to vector<24x1xf32>
    %16 = tpu.reciprocal %15 {approx = true} : vector<24x1xf32> -> vector<24x1xf32>
    %17 = vector.broadcast %16 : vector<24x1xf32> to vector<24x128xf32>
    %18 = arith.mulf %13, %17 : vector<24x128xf32>
    %cst_7 = arith.constant 0.000000e+00 : f32
    %19 = vector.broadcast %cst_7 : f32 to vector<24x128xf32>
    %20 = arith.maximumf %8, %19 : vector<24x128xf32>
    %21 = arith.mulf %18, %20 : vector<24x128xf32>
    %22 = arith.truncf %20 : vector<24x128xf32> to vector<24x128xbf16>
    %c0_8 = arith.constant 0 : index
    %c0_9 = arith.constant 0 : index
    %23 = vector.load %arg4[%c0_8, %c0_9] : memref<128x32xbf16, #tpu.memory_space<vmem>>, vector<128x32xbf16>
    %cst_10 = arith.constant dense<0.000000e+00> : vector<24x32xf32>
    %24 = tpu.matmul %22, %23, %cst_10 {dimension_numbers = #tpu.dot_dimension_numbers<[1], [0], [0], [1], [0, 0, 1, 1], [], []>} : vector<24x128xbf16>, vector<128x32xbf16>, vector<24x32xf32> -> vector<24x32xf32>
    %25 = arith.truncf %21 : vector<24x128xf32> to vector<24x128xbf16>
    %c0_11 = arith.constant 0 : index
    %c0_12 = arith.constant 0 : index
    %26 = vector.load %arg5[%c0_11, %c0_12] : memref<128x32xbf16, #tpu.memory_space<vmem>>, vector<128x32xbf16>
    %cst_13 = arith.constant dense<0.000000e+00> : vector<24x32xf32>
    %27 = tpu.matmul %25, %26, %cst_13 {dimension_numbers = #tpu.dot_dimension_numbers<[1], [0], [0], [1], [0, 0, 1, 1], [], []>} : vector<24x128xbf16>, vector<128x32xbf16>, vector<24x32xf32> -> vector<24x32xf32>
    %28 = arith.addf %24, %27 : vector<24x32xf32>
    %c0_14 = arith.constant 0 : index
    %c0_15 = arith.constant 0 : index
    %29 = vector.load %arg6[%c0_14, %c0_15] : memref<1x32xf32, #tpu.memory_space<vmem>>, vector<1x32xf32>
    %30 = vector.broadcast %29 : vector<1x32xf32> to vector<24x32xf32>
    %31 = arith.addf %28, %30 : vector<24x32xf32>
    %c0_16 = arith.constant 0 : index
    %c0_17 = arith.constant 0 : index
    %32 = vector.load %arg7[%c0_16, %c0_17] : memref<24x32xf32, #tpu.memory_space<vmem>>, vector<24x32xf32>
    tpu.vector_store %arg7[%c0_16, %c0_17], %31 {strides = array<i32>} : memref<24x32xf32, #tpu.memory_space<vmem>>, vector<24x32xf32>,
    return
  }
  func.func @transform_0(%arg0: i32) -> (i32, i32) {
    %c0_i32 = arith.constant 0 : i32
    %c0_i32_0 = arith.constant 0 : i32
    return %arg0, %c0_i32 : i32, i32
  }
  func.func @transform_1(%arg0: i32) -> (i32, i32) {
    %c0_i32 = arith.constant 0 : i32
    %c0_i32_0 = arith.constant 0 : i32
    %c0_i32_1 = arith.constant 0 : i32
    return %c0_i32, %c0_i32_0 : i32, i32
  }
  func.func @transform_2(%arg0: i32) -> (i32, i32) {
    %c0_i32 = arith.constant 0 : i32
    %c0_i32_0 = arith.constant 0 : i32
    %c0_i32_1 = arith.constant 0 : i32
    return %c0_i32, %c0_i32_0 : i32, i32
  }
  func.func @transform_3(%arg0: i32) -> (i32, i32) {
    %c0_i32 = arith.constant 0 : i32
    %c0_i32_0 = arith.constant 0 : i32
    %c0_i32_1 = arith.constant 0 : i32
    return %c0_i32, %c0_i32_0 : i32, i32
  }
  func.func @transform_4(%arg0: i32) -> (i32, i32) {
    %c0_i32 = arith.constant 0 : i32
    %c0_i32_0 = arith.constant 0 : i32
    %c0_i32_1 = arith.constant 0 : i32
    return %c0_i32, %c0_i32_0 : i32, i32
  }
  func.func @transform_5(%arg0: i32) -> (i32, i32) {
    %c0_i32 = arith.constant 0 : i32
    %c0_i32_0 = arith.constant 0 : i32
    %c0_i32_1 = arith.constant 0 : i32
    return %c0_i32, %c0_i32_0 : i32, i32
  }
  func.func @transform_6(%arg0: i32) -> (i32, i32) {
    %c0_i32 = arith.constant 0 : i32
    %c0_i32_0 = arith.constant 0 : i32
    return %arg0, %c0_i32 : i32, i32
  }
}

</mosaic_0001>

<bundles_post_ra>
// kernel: tpu_custom_call.1
= control target key start
LH: loop header
LB: loop body
LE: loop exit
PB: predicated region body
PF: predicated region fallthrough
CT: control target
= control target key end

     0   :  { %s794_s21 = smov 0   ;;  %s903_s0 = inlined_call_operand.vmem [shape: f32[48,32], index: 0, kind: input, shape index: {}]   ;;  %s904_s1 = inlined_call_operand.vmem [shape: bf16[32,256], index: 1, kind: input, shape index: {}]   ;;  %s905_s2 = inlined_call_operand.vmem [shape: f32[1,256], index: 2, kind: input, shape index: {}]   ;;  %s906_s3 = inlined_call_operand.vmem [shape: bf16[128,32], index: 3, kind: input, shape index: {}]   ;;  %s907_s4 = inlined_call_operand.vmem [shape: bf16[128,32], index: 4, kind: input, shape index: {}]   ;;  %s908_s5 = inlined_call_operand.vmem [shape: f32[1,32], index: 5, kind: input, shape index: {}]   ;;  %s909_s6 = inlined_call_operand.vmem [shape: f32[48,32], index: 6, kind: output, shape index: {}]  }
   0x1 LB: > { %s601_s22 = sadd.s32 4294967295, %s757_s21   ;;  %p605_p0 = scmp.ge.s32.totalorder %s757_s21, 1  ;;  %s757_s21 = sphi %s794_s21, %s16_s21  }
   0x2   : > { %p213_p1 = scmp.lt.s32.totalorder %s757_s21, 3 }
   0x4   : > { %p214_p2 = pnand %p605_p0, %p213_p1 }
   0x5   : > { %s243_s7 = smul.u32 (!%p214_p2), 3, %s601_s22 }
   0x6   : > { %217 = sbr.rel (%p214_p2) target bundleno = 576 (0x240), region = 44 }
   0x7   : > { %p244_p3 = scmp.lt.s32.totalorder (!%p214_p2), %s243_s7, 5 }
   0xb   : > { %v618_v0 = vld [vmem:[%s904_s1 + $0x10] sm:$0xf]  ;;  %v697_v1 = vld [vmem:[%s904_s1 + $0x14] sm:$0xf0]  ;;  %v610_v2 = vld [vmem:[%s904_s1] sm:$0xf] }
   0xc   : > { %v619_v3 = vor.u32 %v697_v1, %v618_v0  ;;  %v695_v4 = vld [vmem:[%s904_s1 + $0x4] sm:$0xf0]  ;;  %s911_s7 = smov (!%p244_p3, %s243_s7), 5  ;;  %vm291_vm0 = vcmask 261120   ;;  %v696_v11 = vld [vmem:[%s904_s1 + $0x14] sm:$0xf] }
   0xd   : > { %v611_v5 = vor.u32 %v695_v4, %v610_v2  ;;  %s606_s8 = sshll.u32 %s911_s7, 3  ;;  %v620_v12 = vld [vmem:[%s904_s1 + $0x18] sm:$0xf0]  ;;  %v694_v13 = vld [vmem:[%s904_s1 + $0x4] sm:$0xf]  ;;  %v704_v28 = vld [vmem:[%s906_s3 + $0x30] sm:$0xff] }
   0xe   : > { %304 = vmatpush.bf16.msra.mxu0 %v619_v3  ;;  %s247_s11 = scalar_lea.vmem %s903_s0, %s606_s8  ;;  %v623_v14 = vor.u32 %v696_v11, %v620_v12  ;;  %v612_v15 = vld [vmem:[%s904_s1 + $0x8] sm:$0xf0]  ;;  %v265_v18 = vld [vmem:[%s905_s2] sm:$0x3]  ;;  %v705_v26 = vld [vmem:[%s906_s3 + $0x38] sm:$0xff]  ;;  %s253_s16 = scalar_lea.vmem %s909_s6, %s606_s8 }
   0xf   : > { %v256_v6 = vld [vmem:[%s247_s11] sm:$0xff]  ;;  %v257_v7 = vld [vmem:[%s247_s11 + $0x8] sm:$0xff]  ;;  %v258_v9 = vld [vmem:[%s247_s11 + $0x10] sm:$0xff]  ;;  %v615_v16 = vor.u32 %v694_v13, %v612_v15  ;;  %v267_v19 = vperm.slane %v265_v18, 0  ;;  %722 = vmatpush.bf16.msra.mxu3 %v705_v26  ;;  %v268_v46 = vperm.slane %v265_v18, 1 }
  0x10   : > { %v259_v8 = vpack.c.bf16 %v257_v7, %v256_v6  ;;  %v260_v10 = vpack.c.bf16 %v258_v9, %v258_v9  ;;  %322 = vmatpush.bf16.msra.mxu1 %v623_v14  ;;  %v713_v27 = vld [vmem:[%s907_s4 + $0x38] sm:$0xff]  ;;  %v712_v29 = vld [vmem:[%s907_s4 + $0x30] sm:$0xff]  ;;  %v703_v32 = vld [vmem:[%s906_s3 + $0x28] sm:$0xff] }
  0x11   : > { %714 = vmatpush.bf16.msra.mxu2 %v713_v27  ;;  %v711_v34 = vld [vmem:[%s907_s4 + $0x28] sm:$0xff]  ;;  %v702_v36 = vld [vmem:[%s906_s3 + $0x20] sm:$0xff]  ;;  %v701_v41 = vld [vmem:[%s906_s3 + $0x18] sm:$0xff] }
  0x12   : > { %305 = vmatpush.bf16.msra.mxu0 %v611_v5  ;;  %v710_v37 = vld [vmem:[%s907_s4 + $0x20] sm:$0xff]  ;;  %v709_v44 = vld [vmem:[%s907_s4 + $0x18] sm:$0xff]  ;;  %v700_v47 = vld [vmem:[%s906_s3 + $0x10] sm:$0xff] }
  0x13   : > { %723 = vmatpush.bf16.msra.mxu3 %v704_v28  ;;  %v699_v52 = vld [vmem:[%s906_s3 + $0x8] sm:$0xff]  ;;  %v698_v56 = vld [vmem:[%s906_s3] sm:$0xff]  ;;  %v708_v59 = vld [vmem:[%s907_s4 + $0x10] sm:$0xff] }
  0x14   : > { %323 = vmatpush.bf16.msra.mxu1 %v615_v16  ;;  %v707_v61 = vld [vmem:[%s907_s4 + $0x8] sm:$0xff]  ;;  %v706_v63 = vld [vmem:[%s907_s4] sm:$0xff] }
  0x15   : > { %624 = vmatmul.msk.bf16.vlgmr.msra.gmra.mxu0 %vm291_vm0, %v259_v8  ;;  %715 = vmatpush.bf16.msra.mxu2 %v712_v29 }
  0x16   : > { %451 = vmatpush.bf16.msrb.mxu0 %v713_v27 }
  0x17   : > { %626 = vmatmul.msk.bf16.vlgmr.msra.gmra.mxu1 %vm291_vm0, %v259_v8  ;;  %724 = vmatpush.bf16.msra.mxu3 %v703_v32 }
  0x18   : > { %517 = vmatpush.bf16.msrb.mxu1 %v705_v26 }
  0x19   : > { %716 = vmatpush.bf16.msra.mxu2 %v711_v34 }
  0x1a   : > { %452 = vmatpush.bf16.msrb.mxu0 %v712_v29 }
  0x1b   : > { %725 = vmatpush.bf16.msra.mxu3 %v702_v36 }
  0x1c   : > { %518 = vmatpush.bf16.msrb.mxu1 %v704_v28 }
  0x1d   : > { %717 = vmatpush.bf16.msra.mxu2 %v710_v37 }
  0x1e   : > { %453 = vmatpush.bf16.msrb.mxu0 %v711_v34 }
  0x1f   : > { %726 = vmatpush.bf16.msra.mxu3 %v701_v41 }
  0x20   : > { %519 = vmatpush.bf16.msrb.mxu1 %v703_v32 }
  0x21   : > { %718 = vmatpush.bf16.msra.mxu2 %v709_v44 }
  0x22   : > { %454 = vmatpush.bf16.msrb.mxu0 %v710_v37 }
  0x23   : > { %727 = vmatpush.bf16.msra.mxu3 %v700_v47 }
  0x24   : > { %520 = vmatpush.bf16.msrb.mxu1 %v702_v36 }
  0x25   : > { %625 = vmatmul.msk.bf16.gmra.mxu0 %vm291_vm0, %v260_v10  ;;  %719 = vmatpush.bf16.msra.mxu2 %v708_v59 }
  0x26   : > { %455 = vmatpush.bf16.msrb.mxu0 %v709_v44 }
  0x27   : > { %627 = vmatmul.msk.bf16.gmra.mxu1 %vm291_vm0, %v260_v10  ;;  %728 = vmatpush.bf16.msra.mxu3 %v699_v52 }
  0x28   : > { %521 = vmatpush.bf16.msrb.mxu1 %v701_v41 }
  0x29   : > { %720 = vmatpush.bf16.msra.mxu2 %v707_v61 }
  0x2a   : > { %456 = vmatpush.bf16.msrb.mxu0 %v708_v59 }
  0x2b   : > { %729 = vmatpush.bf16.msra.mxu3 %v698_v56 }
  0x2c   : > { %522 = vmatpush.bf16.msrb.mxu1 %v700_v47 }
  0x2d   : > { %721 = vmatpush.bf16.msra.mxu2 %v706_v63 }
  0x2e   : > { %457 = vmatpush.bf16.msrb.mxu0 %v707_v61 }
  0x30   : > { %523 = vmatpush.bf16.msrb.mxu1 %v699_v52 }
  0x32   : > { %458 = vmatpush.bf16.msrb.mxu0 %v706_v63 }
  0x34   : > { %524 = vmatpush.bf16.msrb.mxu1 %v698_v56 }
  0x92   : > { %v307_v17 = vpop.f32.mrf.mxu0 }
  0x93   : > { %v308_v25 = vadd.f32 %v307_v17, %v267_v19 }
  0x94   : > { %v325_v35 = vpop.f32.mrf.mxu1 }
  0x95   : > { %v326_v50 = vadd.f32 %v325_v35, %v268_v46 }
  0x97   : > { %v361_v54 = vmax.f32 %v326_v50, 0.0 }
  0x9a   : > { %v309_v20 = vpop.f32.mrf.mxu0 }
  0x9b   : > { %v310_v21 = vadd.f32 %v309_v20, %v267_v19 }
  0x9c   : > { %v327_v48 = vpop.f32.mrf.mxu1 }
  0x9d   : > { %336 = vmax.xlane.f32.xlu1 %v310_v21  ;;  %v328_v51 = vadd.f32 %v327_v48, %v268_v46 }
  0x9f   : > { %v362_v55 = vmax.f32 %v328_v51, 0.0 }
  0xa1   : > { %v367_v57 = vpack.c.bf16 %v362_v55, %v361_v54 }
  0xa2   : > { %v312_v22 = vpop.f32.mrf.mxu0 }
  0xa3   : > { %v313_v23 = vadd.f32 %v312_v22, %v267_v19  ;;  %525 = vmatmul.bf16.vlgmr.msrb.gmra.mxu1 %v367_v57  ;;  %v738_v19 = vld [vmem:[%s908_s5] ss:$0 sm:$0xff] }
  0xa4   : > { %v330_v60 = vpop.f32.mrf.mxu1 }
  0xa5   : > { %338 = vmax.xlane.f32.xlu0 %v313_v23  ;;  %v331_v62 = vadd.f32 %v330_v60, %v268_v46 }
  0xa7   : > { %v363_v1 = vmax.f32 %v331_v62, 0.0 }
  0xa9   : > { %v368_v2 = vpack.c.bf16 %v363_v1, %v363_v1 }
  0xaa   : > { %v314_v24 = vpop.f32.mrf.mxu0 }
  0xab   : > { %530 = vmatmul.bf16.vlgmr.msra.gmra.mxu3 %v368_v2 }
  0xac   : > { %v332_v0 = vpop.f32.mrf.mxu1 }
  0xad   : > { %334 = vmax.xlane.f32.xlu0 %v308_v25 }
 0x110   : > { %v337_v40 = vpop.xlane.xlu1 %336 }
 0x111   : > { %v341_v45 = vsub.f32 %v310_v21, %v337_v40 }
 0x113   : > { %v345_v49 = vmul.f32 1.442695, %v341_v45 }
 0x118   : > { %v339_v30 = vpop.xlane.xlu0 %338 }
 0x119   : > { %v342_v31 = vsub.f32 %v313_v23, %v339_v30 }
 0x11b   : > { %v347_v33 = vmul.f32 1.442695, %v342_v31 }
 0x11d   : > { %739 = vpow2.f32 %v347_v33 }
 0x120   : > { %v335_v38 = vpop.xlane.xlu0 %334  ;;  %v526_v23 = vpop.f32.mrf.mxu1 }
 0x121   : > { %v340_v39 = vsub.f32 %v308_v25, %v335_v38 }
 0x123   : > { %v740_v42 = vpop.eup %739  ;;  %v343_v43 = vmul.f32 1.442695, %v340_v39 }
 0x124   : > { %353 = vadd.xlane.f32.xlu1 %v740_v42 }
 0x125   : > { %741 = vpow2.f32 %v343_v43 }
 0x126   : > { %743 = vpow2.f32 %v345_v49 }
 0x128   : > { %v528_v28 = vpop.f32.mrf.mxu1 }
 0x12b   : > { %v742_v53 = vpop.eup %741 }
 0x12c   : > { %349 = vadd.xlane.f32.xlu2 %v742_v53  ;;  %v744_v58 = vpop.eup %743 }
 0x12e   : > { %v531_v17 = vpop.f32.mrf.mxu3 }
 0x134   : > { %351 = vadd.xlane.f32.xlu2 %v744_v58 }
 0x136   : > { %v533_v18 = vpop.f32.mrf.mxu3 }
 0x197   : > { %v354_v3 = vpop.xlane.xlu1 %353 }
 0x198   : > { %745 = vrcp.f32 %v354_v3 }
 0x19e   : > { %v746_v4 = vpop.eup %745 }
 0x19f   : > { %v350_v5 = vpop.xlane.xlu2 %349  ;;  %v360_v6 = vmul.f32 %v746_v4, %v740_v42 }
 0x1a0   : > { %747 = vrcp.f32 %v350_v5 }
 0x1a1   : > { %v366_v7 = vmul.f32 %v363_v1, %v360_v6 }
 0x1a3   : > { %v386_v8 = vpack.c.bf16 %v366_v7, %v366_v7 }
 0x1a5   : > { %464 = vmatmul.bf16.vlgmr.msra.gmra.mxu2 %v386_v8 }
 0x1a6   : > { %v748_v10 = vpop.eup %747 }
 0x1a7   : > { %v352_v9 = vpop.xlane.xlu2 %351  ;;  %v358_v11 = vmul.f32 %v748_v10, %v742_v53 }
 0x1a8   : > { %749 = vrcp.f32 %v352_v9 }
 0x1a9   : > { %v364_v14 = vmul.f32 %v361_v54, %v358_v11 }
 0x1ae   : > { %v750_v12 = vpop.eup %749 }
 0x1af   : > { %v359_v13 = vmul.f32 %v750_v12, %v744_v58 }
 0x1b1   : > { %v365_v15 = vmul.f32 %v362_v55, %v359_v13 }
 0x1b3   : > { %v385_v16 = vpack.c.bf16 %v365_v15, %v364_v14 }
 0x1b5   : > { %459 = vmatmul.bf16.vlgmr.msrb.gmra.mxu0 %v385_v16 }
 0x228   : > { %v465_v20 = vpop.f32.mrf.mxu2 }
 0x229   : > { %v532_v21 = vadd.f32 %v531_v17, %v465_v20 }
 0x22b   : > { %v541_v22 = vadd.f32 %v738_v19, %v532_v21 }
 0x22d   : > { %544 = vst.msk [vmem:[%s253_s16 + $0x10] sm:$0xff] %vm291_vm0, %v541_v22 }
 0x230   : > { %v467_v24 = vpop.f32.mrf.mxu2 }
 0x232   : > { %v460_v25 = vpop.f32.mrf.mxu0 }
 0x233   : > { %v527_v26 = vadd.f32 %v526_v23, %v460_v25 }
 0x235   : > { %v539_v27 = vadd.f32 %v738_v19, %v527_v26 }
 0x237   : > { %542 = vst.msk [vmem:[%s253_s16] sm:$0xff] %vm291_vm0, %v539_v27 }
 0x23a   : > { %v462_v29 = vpop.f32.mrf.mxu0 }
 0x23b   : > { %v529_v30 = vadd.f32 %v528_v28, %v462_v29 }
 0x23d   : > { %v540_v31 = vadd.f32 %v738_v19, %v529_v30 }
 0x23f   : > { %543 = vst.msk [vmem:[%s253_s16 + $0x8] sm:$0xff] %vm291_vm0, %v540_v31 }
 0x240 PF: > { %s16_s21 = sadd.s32 1, %s757_s21  }
 0x241   : > { %p13_p4 = scmp.ge.s32.totalorder %s16_s21, 4  }
 0x243   :  { %15 = sbr.rel (!%p13_p4) target bundleno = 1 (0x1), region = 74 }

</bundles_post_ra>
